<compile_context>
chip_gen: v7x
topology: tpu7x:2x2x1
jax: 0.10.0
libtpu: 0.0.40
codegen_flags: <defaults>
</compile_context>

<pallas_src>
import functools

import jax
import jax.numpy as jnp
from jax.experimental import pallas as pl
from jax.experimental.pallas import tpu as pltpu


def _choose_tq(n, block_q):
    """Largest query-tile size <= block_q that divides N and is sublane aligned."""
    for cand in (block_q, 512, 256, 128, 64, 32, 16, 8):
        if cand <= n and n % cand == 0 and cand % 8 == 0:
            return cand
    return n  # odd N: fall back to a single full-size tile


def _choose_bb(b, n):
    """Pack several batches per grid step when the per-batch work is tiny."""
    if n >= 128:
        return 1
    target = max(1, 1024 // max(n, 1))
    bb = 1
    for cand in range(1, b + 1):
        if b % cand == 0 and cand <= target:
            bb = cand
    return bb


def _attn_kernel(x_ref, w_ref, b_ref, *rest, tq, has_mask, emit_attn,
                 matmul_dtype):
    # Positional layout of `rest`: [mask?] out [attn?] q_scratch
    idx = 0
    mask_ref = None
    if has_mask:
        mask_ref = rest[idx]
        idx += 1
    out_ref = rest[idx]
    idx += 1
    attn_ref = None
    if emit_attn:
        attn_ref = rest[idx]
        idx += 1
    q_scr = rest[idx]

    qi = pl.program_id(1)
    bb, n, c = x_ref.shape

    # ---- Fused QKV projection (one MXU matmul, f32 accumulation). ----------
    # 1/sqrt(C) is already folded into the Q columns of w / b by the wrapper.
    x2 = x_ref[...].reshape(bb * n, c)
    w = w_ref[...]
    qkv = jnp.dot(x2.astype(matmul_dtype), w.astype(matmul_dtype),
                  preferred_element_type=jnp.float32)
    qkv = (qkv + b_ref[...].astype(jnp.float32)).reshape(bb, n, 3 * c)

    k = qkv[:, :, c:2 * c]          # (BB, N, C)
    v = qkv[:, :, 2 * c:]           # (BB, N, C)

    # Stash Q rows in VMEM scratch so the current query tile can be pulled out
    # with a plain dynamic ref slice (no value dynamic_slice needed).
    q_scr[...] = qkv[:, :, :c]
    q_start = pl.multiple_of(qi * tq, tq)
    q_t = q_scr[:, pl.ds(q_start, tq), :]                         # (BB, TQ, C)

    # ---- Scores for this query tile: (BB, TQ, N). ---------------------------
    scores = jnp.einsum("bqc,bkc->bqk",
                        q_t.astype(matmul_dtype), k.astype(matmul_dtype),
                        preferred_element_type=jnp.float32)
    if mask_ref is not None:
        scores = jnp.where(mask_ref[...] == 0, jnp.float32(-1e9), scores)

    # ---- Row-block softmax. --------------------------------------------------
    m = jnp.max(scores, axis=-1, keepdims=True)
    p = jnp.exp(scores - m)
    denom = jnp.sum(p, axis=-1, keepdims=True)
    attn = p * pl.reciprocal(denom, approx=True)   # EUP vrcp (free slot)

    # ---- Attend values. ------------------------------------------------------
    attended = jnp.einsum("bqk,bkc->bqc",
                          attn.astype(matmul_dtype), v.astype(matmul_dtype),
                          preferred_element_type=jnp.float32)

    out_ref[...] = attended.astype(out_ref.dtype)
    if attn_ref is not None:
        attn_ref[...] = attn.astype(attn_ref.dtype)


def point_cloud_attention(points, params, mask=None, *, block_q=256,
                          return_attn=True, attn_dtype=jnp.float32,
                          matmul_dtype=None):
    """points: [B, N, C]; params: (wq, bq, wk, bk, wv, bv) in nn.Linear layout
    (W: (out, in), b: (out,)); mask: optional [B, N, N] (nonzero = keep)."""
    B, N, C = points.shape
    wq, bq, wk, bk, wv, bv = params
    scale = 1.0 / (C ** 0.5)

    # Fuse Q/K/V into one (C, 3C) weight; fold the attention scale into Q.
    w_qkv = jnp.concatenate([wq.T * scale, wk.T, wv.T], axis=1)           # (C, 3C)
    b_qkv = jnp.concatenate([bq * scale, bk, bv], axis=0).reshape(1, 3 * C)

    if matmul_dtype is None:
        matmul_dtype = points.dtype   # pass jnp.bfloat16 for MXU-native matmuls

    TQ = _choose_tq(N, block_q)       # query tile; budget: ~O(TQ*N) VMEM per step
    BB = _choose_bb(B, N)             # batch block for tiny N
    grid = (B // BB, N // TQ)

    in_specs = [
        pl.BlockSpec((BB, N, C), lambda b, q: (b, 0, 0)),     # full points per batch block
        pl.BlockSpec((C, 3 * C), lambda b, q: (0, 0)),        # fused QKV weight
        pl.BlockSpec((1, 3 * C), lambda b, q: (0, 0)),        # fused QKV bias
    ]
    args = [points, w_qkv, b_qkv]

    has_mask = mask is not None
    if has_mask:
        # int8 key mask, streamed per query tile (preserves `mask == 0` semantics).
        mask_i8 = (mask != 0).astype(jnp.int8)
        in_specs.append(pl.BlockSpec((BB, TQ, N), lambda b, q: (b, q, 0)))
        args.append(mask_i8)

    out_specs = [pl.BlockSpec((BB, TQ, C), lambda b, q: (b, q, 0))]
    out_shapes = [jax.ShapeDtypeStruct((B, N, C), points.dtype)]
    if return_attn:
        out_specs.append(pl.BlockSpec((BB, TQ, N), lambda b, q: (b, q, 0)))
        out_shapes.append(jax.ShapeDtypeStruct((B, N, N), attn_dtype))

    kernel = functools.partial(_attn_kernel, tq=TQ, has_mask=has_mask,
                               emit_attn=return_attn, matmul_dtype=matmul_dtype)

    outs = pl.pallas_call(
        kernel,
        out_shape=tuple(out_shapes),
        grid_spec=pltpu.PrefetchScalarGridSpec(
            num_scalar_prefetch=0,
            grid=grid,
            in_specs=in_specs,
            out_specs=tuple(out_specs),
            # Scratch for the (scale-folded) Q rows; rewritten every step, so
            # both grid axes stay megacore-parallel (no cross-step carry).
            scratch_shapes=[pltpu.VMEM((BB, N, C), jnp.float32)],
        ),
        compiler_params=pltpu.CompilerParams(
            dimension_semantics=("parallel", "parallel")),
    )(*args)

    if return_attn:
        return outs[0], outs[1]
    return outs[0]


def _reference(points, params, mask=None):
    wq, bq, wk, bk, wv, bv = params
    q = points @ wq.T + bq
    k = points @ wk.T + bk
    v = points @ wv.T + bv
    C = points.shape[-1]
    scores = jnp.einsum("bnc,bmc->bnm", q, k) / (C ** 0.5)
    if mask is not None:
        scores = jnp.where(mask == 0, -1e9, scores)
    attn = jax.nn.softmax(scores, axis=-1)
    out = jnp.einsum("bnm,bmc->bnc", attn, v)
    return out, attn


if __name__ == "__main__":
    key = jax.random.PRNGKey(0)

    def make_params(k, C):
        ks = jax.random.split(k, 6)
        s = 1.0 / (C ** 0.5)
        shapes = [(C, C), (C,), (C, C), (C,), (C, C), (C,)]
        return tuple(jax.random.uniform(ks[i], shp, jnp.float32, -s, s)
                     for i, shp in enumerate(shapes))

    # Tolerances: f32 path with EUP approximate reciprocal in the softmax.
    ATOL = RTOL = 2e-2

    # --- Small shape (B, N, C) consistent with the module. ------------------
    B, N, C = 2, 8, 32
    k_x, k_p, k_rest = jax.random.split(key, 3)
    points = jax.random.normal(k_x, (B, N, C), dtype=jnp.float32)
    params = make_params(k_p, C)

    out, attn = point_cloud_attention(points, params)
    jax.block_until_ready((out, attn))
    ref_out, ref_attn = _reference(points, params)
    assert jnp.allclose(out, ref_out, atol=ATOL, rtol=RTOL)
    assert jnp.allclose(attn, ref_attn, atol=ATOL, rtol=RTOL)

    # attn-free variant (drops the N^2 HBM writeback entirely).
    out_noattn = point_cloud_attention(points, params, return_attn=False)
    jax.block_until_ready(out_noattn)
    assert jnp.allclose(out_noattn, ref_out, atol=ATOL, rtol=RTOL)

    # --- Larger masked case exercising the query-tiled grid (TQ < N). -------
    B2, N2 = 2, 512
    kx2, km2, kp2 = jax.random.split(k_rest, 3)
    points2 = jax.random.normal(kx2, (B2, N2, C), dtype=jnp.float32)
    params2 = make_params(kp2, C)
    mask2 = (jax.random.uniform(km2, (B2, N2, N2)) > 0.3).astype(jnp.int32)
    mask2 = jnp.maximum(mask2, jnp.eye(N2, dtype=jnp.int32)[None])  # no all-masked rows

    out2, attn2 = point_cloud_attention(points2, params2, mask=mask2, block_q=128)
    jax.block_until_ready((out2, attn2))
    ref_out2, ref_attn2 = _reference(points2, params2, mask=mask2)
    assert jnp.allclose(out2, ref_out2, atol=ATOL, rtol=RTOL)
    assert jnp.allclose(attn2, ref_attn2, atol=ATOL, rtol=RTOL)

    print("KERNEL_OK")
</pallas_src>

<mosaic_0001>
module attributes {stable_mosaic.version = 11 : i64} {
  func.func @_attn_kernel(%arg0: i32, %arg1: i32, %arg2: memref<2x8x32xf32, #tpu.memory_space<vmem>>, %arg3: memref<32x96xf32, #tpu.memory_space<vmem>>, %arg4: memref<1x96xf32, #tpu.memory_space<vmem>>, %arg5: memref<2x8x32xf32, #tpu.memory_space<vmem>>, %arg6: memref<2x8x8xf32, #tpu.memory_space<vmem>>, %arg7: memref<2x8x32xf32, #tpu.memory_space<vmem>>) attributes {dimension_semantics = [#tpu.dimension_semantics<parallel>, #tpu.dimension_semantics<parallel>], iteration_bounds = array<i64: 1, 1>, scalar_prefetch = 0 : i64, scratch_operands = 1 : i64, tpu.core_type = #tpu.core_type<tc>, window_params = [{transform_indices = @transform_0, window_bounds = array<i64: 2, 8, 32>}, {pipeline_mode = #tpu.pipeline_mode<synchronous>, transform_indices = @transform_1, window_bounds = array<i64: 32, 96>}, {pipeline_mode = #tpu.pipeline_mode<synchronous>, transform_indices = @transform_2, window_bounds = array<i64: 1, 96>}, {transform_indices = @transform_3, window_bounds = array<i64: 2, 8, 32>}, {transform_indices = @transform_4, window_bounds = array<i64: 2, 8, 8>}]} {
    %c0 = arith.constant 0 : index
    %c0_0 = arith.constant 0 : index
    %c0_1 = arith.constant 0 : index
    %0 = vector.load %arg2[%c0, %c0_0, %c0_1] : memref<2x8x32xf32, #tpu.memory_space<vmem>>, vector<2x8x32xf32>
    %1 = vector.shape_cast %0 : vector<2x8x32xf32> to vector<16x32xf32>
    %c0_2 = arith.constant 0 : index
    %c0_3 = arith.constant 0 : index
    %2 = vector.load %arg3[%c0_2, %c0_3] : memref<32x96xf32, #tpu.memory_space<vmem>>, vector<32x96xf32>
    %cst = arith.constant dense<0.000000e+00> : vector<16x96xf32>
    %3 = tpu.matmul %1, %2, %cst {dimension_numbers = #tpu.dot_dimension_numbers<[1], [0], [0], [1], [0, 0, 1, 1], [], []>} : vector<16x32xf32>, vector<32x96xf32>, vector<16x96xf32> -> vector<16x96xf32>
    %c0_4 = arith.constant 0 : index
    %c0_5 = arith.constant 0 : index
    %4 = vector.load %arg4[%c0_4, %c0_5] : memref<1x96xf32, #tpu.memory_space<vmem>>, vector<1x96xf32>
    %5 = vector.broadcast %4 : vector<1x96xf32> to vector<16x96xf32>
    %6 = arith.addf %3, %5 : vector<16x96xf32>
    %7 = vector.shape_cast %6 : vector<16x96xf32> to vector<2x8x96xf32>
    %8 = vector.extract_strided_slice %7 {offsets = [0, 0, 32], sizes = [2, 8, 32], strides = [1, 1, 1]} : vector<2x8x96xf32> to vector<2x8x32xf32>
    %9 = vector.extract_strided_slice %7 {offsets = [0, 0, 64], sizes = [2, 8, 32], strides = [1, 1, 1]} : vector<2x8x96xf32> to vector<2x8x32xf32>
    %10 = vector.extract_strided_slice %7 {offsets = [0, 0, 0], sizes = [2, 8, 32], strides = [1, 1, 1]} : vector<2x8x96xf32> to vector<2x8x32xf32>
    %c0_6 = arith.constant 0 : index
    %c0_7 = arith.constant 0 : index
    %c0_8 = arith.constant 0 : index
    %11 = vector.load %arg7[%c0_6, %c0_7, %c0_8] : memref<2x8x32xf32, #tpu.memory_space<vmem>>, vector<2x8x32xf32>
    tpu.vector_store %arg7[%c0_6, %c0_7, %c0_8], %10 {strides = array<i32>} : memref<2x8x32xf32, #tpu.memory_space<vmem>>, vector<2x8x32xf32>,
    %c8_i32 = arith.constant 8 : i32
    %12 = arith.muli %arg1, %c8_i32 : i32
    %13 = tpu.assume_multiple %12, 8 : i32
    %c0_9 = arith.constant 0 : index
    %14 = arith.index_cast %13 : i32 to index
    %c0_10 = arith.constant 0 : index
    %15 = vector.load %arg7[%c0_9, %14, %c0_10] : memref<2x8x32xf32, #tpu.memory_space<vmem>>, vector<2x8x32xf32>
    "tpu.trace_start"() <{level = 10 : i32, message = "bqc,bkc->bqk"}> : () -> ()
    %cst_11 = arith.constant dense<0.000000e+00> : vector<2x8x8xf32>
    %16 = tpu.matmul %15, %8, %cst_11 {dimension_numbers = #tpu.dot_dimension_numbers<[2], [2], [1], [1], [0, 0, 0, 1, 1, 1], [0], [0]>} : vector<2x8x32xf32>, vector<2x8x32xf32>, vector<2x8x8xf32> -> vector<2x8x8xf32>
    "tpu.trace_stop"() : () -> ()
    %cst_12 = arith.constant dense<0xFF800000> : vector<2x8xf32>
    %17 = vector.multi_reduction <maximumf>, %16, %cst_12 [2] : vector<2x8x8xf32> to vector<2x8xf32>
    %18 = vector.shape_cast %17 : vector<2x8xf32> to vector<2x8x1xf32>
    %19 = vector.broadcast %18 : vector<2x8x1xf32> to vector<2x8x8xf32>
    %20 = arith.subf %16, %19 : vector<2x8x8xf32>
    %21 = math.exp %20 : vector<2x8x8xf32>
    %cst_13 = arith.constant dense<0.000000e+00> : vector<2x8xf32>
    %22 = vector.multi_reduction <add>, %21, %cst_13 [2] : vector<2x8x8xf32> to vector<2x8xf32>
    %23 = vector.shape_cast %22 : vector<2x8xf32> to vector<2x8x1xf32>
    %24 = tpu.reciprocal %23 {approx = true} : vector<2x8x1xf32> -> vector<2x8x1xf32>
    %25 = vector.broadcast %24 : vector<2x8x1xf32> to vector<2x8x8xf32>
    %26 = arith.mulf %21, %25 : vector<2x8x8xf32>
    "tpu.trace_start"() <{level = 10 : i32, message = "bqk,bkc->bqc"}> : () -> ()
    %cst_14 = arith.constant dense<0.000000e+00> : vector<2x8x32xf32>
    %27 = tpu.matmul %26, %9, %cst_14 {dimension_numbers = #tpu.dot_dimension_numbers<[2], [1], [1], [2], [0, 0, 0, 1, 1, 2], [0], [0]>} : vector<2x8x8xf32>, vector<2x8x32xf32>, vector<2x8x32xf32> -> vector<2x8x32xf32>
    "tpu.trace_stop"() : () -> ()
    %c0_15 = arith.constant 0 : index
    %c0_16 = arith.constant 0 : index
    %c0_17 = arith.constant 0 : index
    %28 = vector.load %arg5[%c0_15, %c0_16, %c0_17] : memref<2x8x32xf32, #tpu.memory_space<vmem>>, vector<2x8x32xf32>
    tpu.vector_store %arg5[%c0_15, %c0_16, %c0_17], %27 {strides = array<i32>} : memref<2x8x32xf32, #tpu.memory_space<vmem>>, vector<2x8x32xf32>,
    %c0_18 = arith.constant 0 : index
    %c0_19 = arith.constant 0 : index
    %c0_20 = arith.constant 0 : index
    %29 = vector.load %arg6[%c0_18, %c0_19, %c0_20] : memref<2x8x8xf32, #tpu.memory_space<vmem>>, vector<2x8x8xf32>
    tpu.vector_store %arg6[%c0_18, %c0_19, %c0_20], %26 {strides = array<i32>} : memref<2x8x8xf32, #tpu.memory_space<vmem>>, vector<2x8x8xf32>,
    return
  }
  func.func @transform_0(%arg0: i32, %arg1: i32) -> (i32, i32, i32) {
    %c0_i32 = arith.constant 0 : i32
    %c0_i32_0 = arith.constant 0 : i32
    %c0_i32_1 = arith.constant 0 : i32
    return %arg0, %c0_i32, %c0_i32_0 : i32, i32, i32
  }
  func.func @transform_1(%arg0: i32, %arg1: i32) -> (i32, i32) {
    %c0_i32 = arith.constant 0 : i32
    %c0_i32_0 = arith.constant 0 : i32
    %c0_i32_1 = arith.constant 0 : i32
    return %c0_i32, %c0_i32_0 : i32, i32
  }
  func.func @transform_2(%arg0: i32, %arg1: i32) -> (i32, i32) {
    %c0_i32 = arith.constant 0 : i32
    %c0_i32_0 = arith.constant 0 : i32
    %c0_i32_1 = arith.constant 0 : i32
    return %c0_i32, %c0_i32_0 : i32, i32
  }
  func.func @transform_3(%arg0: i32, %arg1: i32) -> (i32, i32, i32) {
    %c0_i32 = arith.constant 0 : i32
    %c0_i32_0 = arith.constant 0 : i32
    return %arg0, %arg1, %c0_i32 : i32, i32, i32
  }
  func.func @transform_4(%arg0: i32, %arg1: i32) -> (i32, i32, i32) {
    %c0_i32 = arith.constant 0 : i32
    %c0_i32_0 = arith.constant 0 : i32
    return %arg0, %arg1, %c0_i32 : i32, i32, i32
  }
}

</mosaic_0001>

<bundles_post_ra>
// kernel: tpu_custom_call.1
= control target key start
LH: loop header
LB: loop body
LE: loop exit
PB: predicated region body
PF: predicated region fallthrough
CT: control target
= control target key end

     0   :  { %10 = vsyncpa [#allocation4], 0  ;;  %s812_s0 = inlined_call_operand.hbm [shape: f32[2,8,32], index: 0, kind: input, shape index: {}]   ;;  %s813_s1 = inlined_call_operand.hbm [shape: f32[32,96], index: 1, kind: input, shape index: {}]   ;;  %s814_s2 = inlined_call_operand.vmem [shape: f32[1,96], index: 2, kind: input, shape index: {}]   ;;  %s815_s3 = inlined_call_operand.hbm [shape: f32[2,8,32], index: 3, kind: output, shape index: {0}]   ;;  %s816_s4 = inlined_call_operand.hbm [shape: f32[2,8,8], index: 4, kind: output, shape index: {1}]  }
   0x1   :  { %11 = vsyncpa [#allocation7], 0 }
   0x2   :  { %12 = vsyncpa [#allocation5], 0 }
   0x3   :  { %13 = vsyncpa [#allocation10], 0  ;;  %s692_s15 = smov [#allocation3]   ;;  %s596_s19 = scalar_lea.hbm %s812_s0, 256 }
   0x4   :  { %s19_s16 = sshll.u32 %s692_s15, 4  ;;  %p597_p0 = scmp.ne.s32.totalorder %s812_s0, %s596_s19  ;;  %s20_s16 = int_to_ptr.vmem [resolvable:$true] %s19_s16 }
   0x5   :  { %p600_p1 = scmp.lt.u32.totalorder %s596_s19, %s812_s0 }
   0x7   :  { %p602_p2 = pnand %p600_p1, %p597_p0 }
   0x9   :  { %605 = shalt.err (!%p602_p2)
}
   0xa   :  { %s606_s24 = scalar_lea.vmem %s20_s16, 256  ;;  %p611_p4 = scmp.lt.s32.totalorder %s20_s16, %s20_s16 }
   0xb   :  { %p607_p3 = scmp.ne.s32.totalorder %s20_s16, %s606_s24  ;;  %p612_p5 = scmp.lt.s32.totalorder %s606_s24, %s606_s24 }
   0xd   :  { %p613_p6 = por %p612_p5, %p611_p4 }
   0xf   :  { %p614_p7 = pnand %p613_p6, %p607_p3 }
  0x11   :  { %617 = shalt.err (!%p614_p7)
}
  0x12   :  { %s693_s25 = smov 128   ;;  %s694_s26 = smov 8  }
  0x13   :  { %25 = dma.hbm_to_vmem [thread:$0]  %s812_s0, 256, %s20_s16, [#allocation4], %s693_s25, %s693_s25, %s694_s26  }
  0x14   :  { %s695_s29 = smov [#allocation6]   ;;  %s618_s7 = scalar_lea.hbm %s813_s1, 512 }
  0x15   :  { %s31_s30 = sshll.u32 %s695_s29, 4  ;;  %p619_p8 = scmp.ne.s32.totalorder %s813_s1, %s618_s7  ;;  %s32_s30 = int_to_ptr.vmem [resolvable:$true] %s31_s30 }
  0x16   :  { %p622_p9 = scmp.lt.u32.totalorder %s618_s7, %s813_s1 }
  0x18   :  { %p624_p10 = pnand %p622_p9, %p619_p8 }
  0x1a   :  { %627 = shalt.err (!%p624_p10)
}
  0x1b   :  { %s628_s12 = scalar_lea.vmem %s32_s30, 512  ;;  %p633_p12 = scmp.lt.s32.totalorder %s32_s30, %s32_s30 }
  0x1c   :  { %p629_p11 = scmp.ne.s32.totalorder %s32_s30, %s628_s12  ;;  %p634_p13 = scmp.lt.s32.totalorder %s628_s12, %s628_s12 }
  0x1e   :  { %p635_p0 = por %p634_p13, %p633_p12 }
  0x20   :  { %p636_p1 = pnand %p635_p0, %p629_p11 }
  0x22   :  { %639 = shalt.err (!%p636_p1)
}
  0x23   :  { %37 = dma.hbm_to_vmem [thread:$0]  %s813_s1, 512, %s32_s30, [#allocation7], %s693_s25, %s693_s25, %s694_s26  }
  0x24   :  { %684 = dma.done.wait [#allocation4], 256  }
  0x25   :  { %685 = vsyncadd [#allocation4], 4294967040 }
  0x26   :  { %686 = dma.done.wait [#allocation7], 512  }
  0x27   :  { %687 = vsyncadd [#allocation7], 4294966784  ;;  %vm59_vm0 = vcmask 261120   ;;  %v48_v0 = vld [vmem:[#allocation6] sm:$0xff]  ;;  %v49_v1 = vld [vmem:[#allocation6 + $0x8] sm:$0xff]  ;;  %v696_v8 = vmov 0.0  }
  0x28   :  { %v50_v2 = vld [vmem:[#allocation6 + $0x10] sm:$0xff]  ;;  %v570_v3 = vpack.c.bf16 %v49_v1, %v48_v0  ;;  %v51_v4 = vld [vmem:[#allocation6 + $0x18] sm:$0xff]  ;;  %550 = vmatprep.subr.mxu1 %v696_v8  ;;  %vm697_vm1 = vmmov 0   ;;  %v516_v9 = vld [vmem:[%s814_s2] ss:$0 sm:$0xff]  ;;  %s698_s15 = smov 96  }
  0x29   :  { %v46_v5 = vld [vmem:[#allocation3] sm:$0xff]  ;;  %v574_v6 = vpack.c.bf16 %v51_v4, %v50_v2  ;;  %v47_v7 = vld [vmem:[#allocation3 + $0x8] sm:$0xff]  ;;  %552 = vmatprep.mubr.msk.f32.mxu1 %vm697_vm1, %v696_v8  ;;  %vm303_vm2 = vcmask 64512   ;;  %s699_s2 = smov 64   ;;  %s700_s16 = smov [#allocation9]  }
  0x2a   :  { %547 = vmatprep.mubr.msk.f32.mxu0 %vm59_vm0, %v46_v5  ;;  %571 = vmatprep.subr.bf16.mxu0 %v570_v3  ;;  %s499_s17 = sshll.u32 %s700_s16, 4  ;;  %s500_s17 = int_to_ptr.vmem [resolvable:$true] %s499_s17 }
  0x2b   :  { %573 = vmatpush3.bf16.msra.mxu0 %v570_v3  ;;  %s640_s18 = scalar_lea.vmem %s500_s17, 256  ;;  %p645_p3 = scmp.lt.s32.totalorder %s500_s17, %s500_s17 }
  0x2c   :  { %575 = vmatprep.subr.bf16.mxu0 %v574_v6  ;;  %p641_p2 = scmp.ne.s32.totalorder %s500_s17, %s640_s18  ;;  %p646_p4 = scmp.lt.s32.totalorder %s640_s18, %s640_s18 }
  0x2e   :  { %p647_p5 = por %p646_p4, %p645_p3 }
  0x2f   :  { %577 = vmatpush3.bf16.msra.mxu0 %v574_v6 }
  0x30   :  { %560 = vmatprep.subr.mxu0 %v696_v8  ;;  %p648_p6 = pnand %p647_p5, %p641_p2 }
  0x32   :  { %548 = vmatmul.mubr.msk.f32.vlgmr.msra.gmra.mrb[0].mxu0 %vm59_vm0, %v47_v7 }
  0x33   :  { %562 = vmatprep.mubr.msk.f32.mxu0 %vm697_vm1, %v696_v8 }
 0x105   :  { %v549_v10 = vpop.f32.mrb[0].mxu0 }
 0x106   :  { %v138_v11 = vadd.f32 %v549_v10, %v516_v9  ;;  %v132_v12 = vpop.f32.mrb[1].mxu0 }
 0x107   :  { %v133_v13 = vadd.f32 %v516_v9, %v132_v12 }
 0x108   :  { %142 = vst.msk [vmem:[#allocation2 + $0x8] sm:$0xff] %vm59_vm0, %v138_v11 }
 0x109   :  { %141 = vst.msk [vmem:[#allocation2] sm:$0xff] %vm59_vm0, %v133_v13  ;;  %148 = vrot.lane.b32.xlu0 %v133_v13, %s698_s15 }
 0x10d   :  { %226 = vrot.lane.b32.xlu0 %v138_v11, %s698_s15 }
 0x10f   :  { %v146_v17 = vld [vmem:[#allocation2 + $0x8] sm:$0xff] }
 0x110   :  { %v145_v15 = vld [vmem:[#allocation2] sm:$0xff] }
 0x17b   :  { %v149_v14 = vpop.permute.xlu0 %148 }
 0x17c   :  { %551 = vmatpush3.xpose.msk.msra.mxu1 %vm59_vm0, %v149_v14 }
 0x17d   :  { %555 = vmatprep.subr.mxu1 %v696_v8 }
 0x17f   :  { %v227_v16 = vpop.permute.xlu0 %226  ;;  %553 = vmatmul.mubr.msk.f32.vlgmr.msra.gmra.mrb[0].mxu1 %vm59_vm0, %v145_v15 }
 0x180   :  { %556 = vmatpush3.xpose.msk.msra.mxu1 %vm59_vm0, %v227_v16  ;;  %557 = vmatprep.mubr.msk.f32.mxu1 %vm697_vm1, %v696_v8 }
 0x181   :  { %565 = vmatprep.subr.mxu1 %v696_v8 }
 0x183   :  { %558 = vmatmul.mubr.msk.f32.vlgmr.msra.gmra.mrb[2].mxu1 %vm59_vm0, %v146_v17 }
 0x184   :  { %567 = vmatprep.mubr.msk.f32.mxu1 %vm697_vm1, %v696_v8 }
 0x252   :  { %v221_v18 = vpop.f32.mrb[0].mxu1 }
 0x253   :  { %v554_v19 = vpop.f32.mrb[1].mxu1  ;;  %v304_v20 = vsel %vm303_vm2, %v221_v18, -inf }
 0x254   :  { %305 = vmax.xlane.f32.xlu1 %v304_v20 }
 0x256   :  { %v299_v21 = vpop.f32.mrb[2].mxu1 }
 0x257   :  { %v559_v22 = vpop.f32.mrb[3].mxu1  ;;  %v307_v23 = vsel %vm303_vm2, %v299_v21, -inf }
 0x258   :  { %308 = vmax.xlane.f32.xlu1 %v307_v23 }
 0x269   :  { %326 = vrot.lane.b32.xlu1 %v133_v13, %s699_s2 }
 0x2e1   :  { %v306_v24 = vpop.xlane.xlu1 %305 }
 0x2e2   :  { %v310_v25 = vsub.f32 %v221_v18, %v306_v24 }
 0x2e4   :  { %v312_v26 = vmul.f32 1.442695, %v310_v25 }
 0x2e5   :  { %v309_v27 = vpop.xlane.xlu1 %308 }
 0x2e6   :  { %588 = vpow2.f32 %v312_v26  ;;  %v311_v28 = vsub.f32 %v299_v21, %v309_v27 }
 0x2e8   :  { %v314_v29 = vmul.f32 1.442695, %v311_v28 }
 0x2e9   :  { %v327_v30 = vpop.permute.xlu1 %326 }
 0x2ea   :  { %590 = vpow2.f32 %v314_v29  ;;  %561 = vmatpush3.msra.mxu0 %v327_v30 }
 0x2f0   :  { %v589_v31 = vpop.eup %588 }
 0x2f1   :  { %v316_v32 = vsel %vm303_vm2, %v589_v31, 0.0 }
 0x2f2   :  { %317 = vadd.xlane.f32.xlu0 %v316_v32 }
 0x2f4   :  { %v591_v33 = vpop.eup %590 }
 0x2f5   :  { %v319_v34 = vsel %vm303_vm2, %v591_v33, 0.0 }
 0x2f6   :  { %320 = vadd.xlane.f32.xlu1 %v319_v34 }
 0x307   :  { %402 = vrot.lane.b32.xlu1 %v138_v11, %s699_s2 }
 0x37f   :  { %v318_v35 = vpop.xlane.xlu0 %317 }
 0x380   :  { %592 = vrcp.f32 %v318_v35 }
 0x383   :  { %v321_v36 = vpop.xlane.xlu1 %320 }
 0x384   :  { %594 = vrcp.f32 %v321_v36 }
 0x387   :  { %v403_v37 = vpop.permute.xlu1 %402 }
 0x388   :  { %566 = vmatpush3.msra.mxu1 %v403_v37 }
 0x38a   :  { %v593_v38 = vpop.eup %592 }
 0x38b   :  { %v324_v39 = vmul.f32 %v593_v38, %v589_v31 }
 0x38d   :  { %480 = vst.msk [vmem:[#allocation9] sm:$0xff] %vm303_vm2, %v324_v39  ;;  %563 = vmatmul.mubr.msk.f32.vlgmr.msra.gmra.mrb[2].mxu0 %vm303_vm2, %v324_v39 }
 0x38e   :  { %v595_v40 = vpop.eup %594 }
 0x38f   :  { %v325_v41 = vmul.f32 %v595_v40, %v591_v33 }
 0x391   :  { %481 = vst.msk [vmem:[#allocation9 + $0x8] sm:$0xff] %vm303_vm2, %v325_v41  ;;  %568 = vmatmul.mubr.msk.f32.vlgmr.msra.gmra.mrb[4].mxu1 %vm303_vm2, %v325_v41 }
 0x392   :  { %651 = shalt.err (!%p648_p6)
}
 0x393   :  { %s652_s21 = scalar_lea.hbm %s816_s4, 256 }
 0x394   :  { %p653_p7 = scmp.ne.s32.totalorder %s816_s4, %s652_s21  ;;  %p656_p8 = scmp.lt.u32.totalorder %s652_s21, %s816_s4 }
 0x396   :  { %p658_p9 = pnand %p656_p8, %p653_p7 }
 0x398   :  { %661 = shalt.err (!%p658_p9)
}
 0x399   :  { %505 = dma.vmem_to_hbm [thread:$0]  %s500_s17, 256, %s816_s4, [#allocation10], %s693_s25, %s693_s25, %s694_s26  }
 0x39a   :  { %s701_s30 = smov [#allocation8]  }
 0x39b   :  { %s487_s5 = sshll.u32 %s701_s30, 4  ;;  %s488_s5 = int_to_ptr.vmem [resolvable:$true] %s487_s5 }
 0x39c   :  { %s662_s6 = scalar_lea.vmem %s488_s5, 256  ;;  %p667_p11 = scmp.lt.s32.totalorder %s488_s5, %s488_s5 }
 0x39d   :  { %p663_p10 = scmp.ne.s32.totalorder %s488_s5, %s662_s6  ;;  %p668_p12 = scmp.lt.s32.totalorder %s662_s6, %s662_s6 }
 0x39f   :  { %p669_p13 = por %p668_p12, %p667_p11 }
 0x3a1   :  { %p670_p0 = pnand %p669_p13, %p663_p10 }
 0x460   :  { %v398_v42 = vpop.f32.mrb[2].mxu0 }
 0x461   :  { %478 = vst.msk [vmem:[#allocation8] sm:$0xff] %vm59_vm0, %v398_v42  ;;  %v564_v43 = vpop.f32.mrb[3].mxu0 }
 0x464   :  { %v474_v44 = vpop.f32.mrb[4].mxu1 }
 0x465   :  { %479 = vst.msk [vmem:[#allocation8 + $0x8] sm:$0xff] %vm59_vm0, %v474_v44  ;;  %v569_v45 = vpop.f32.mrb[5].mxu1 }
 0x466   :  { %673 = shalt.err (!%p670_p0)
}
 0x467   :  { %s674_s8 = scalar_lea.hbm %s815_s3, 256 }
 0x468   :  { %p675_p1 = scmp.ne.s32.totalorder %s815_s3, %s674_s8  ;;  %p678_p2 = scmp.lt.u32.totalorder %s674_s8, %s815_s3 }
 0x46a   :  { %p680_p3 = pnand %p678_p2, %p675_p1 }
 0x46c   :  { %683 = shalt.err (!%p680_p3)
}
 0x46d   :  { %493 = dma.vmem_to_hbm [thread:$0]  %s488_s5, 256, %s815_s3, [#allocation5], %s693_s25, %s693_s25, %s694_s26  }
 0x46e   :  { %688 = dma.done.wait [#allocation5], 256  }
 0x46f   :  { %689 = vsyncadd [#allocation5], 4294967040 }
 0x470   :  { %690 = dma.done.wait [#allocation10], 256  }
 0x471   :  { %691 = vsyncadd [#allocation10], 4294967040 }
 0x472   :  { %512 = vsyncpa [#allocation4], 1 }
 0x473   :  { %513 = vsyncpa [#allocation7], 1 }
 0x474   :  { %514 = vsyncpa [#allocation5], 1 }
 0x475   :  { %515 = vsyncpa [#allocation10], 1 }

</bundles_post_ra>
